<compile_context>
chip_gen: v5e
topology: v5e:2x2
jax: 0.10.0
libtpu: 0.0.40
codegen_flags: <defaults>
</compile_context>

<pallas_src>
import functools

import jax
import jax.numpy as jnp
from jax.experimental import pallas as pl
from jax.experimental.pallas import tpu as pltpu

LANE = 128  # TPU lane width


def _round_up(n, m):
    return ((n + m - 1) // m) * m


def _pad_to(a, target_shape):
    pads = [(0, t - s) for s, t in zip(a.shape, target_shape)]
    if all(p == (0, 0) for p in pads):
        return a
    return jnp.pad(a, pads)


def _pick_batch_tile(batch, max_tile=256):
    """Whole batch in one step when small; else the largest divisor <= max_tile."""
    if batch <= max_tile:
        return batch
    for t in range(max_tile, 0, -8):
        if batch % t == 0:
            return t
    return batch  # fallback: single step


def _mlp_kernel(n_layers, compute_dtype, *refs):
    """Fused MLP forward for one batch tile.

    refs = (x_ref, w0, b0, w1, b1, ..., w_{n-1}, b_{n-1}, out_ref)
    Hidden layers: ReLU(h @ W + b); final layer: h @ W + b (no ReLU).
    Matmuls run in `compute_dtype` (bf16) with f32 accumulation; bias/ReLU in f32.
    """
    x_ref = refs[0]
    out_ref = refs[-1]
    param_refs = refs[1:-1]
    assert len(param_refs) == 2 * n_layers

    h = x_ref[...].astype(jnp.float32)
    for i in range(n_layers):
        w = param_refs[2 * i][...].astype(compute_dtype)
        b = param_refs[2 * i + 1][...].astype(jnp.float32)  # (1, out_p)
        acc = jnp.dot(h.astype(compute_dtype), w,
                      preferred_element_type=jnp.float32) + b
        h = jnp.maximum(acc, 0.0) if i < n_layers - 1 else acc
    out_ref[...] = h.astype(out_ref.dtype)


def discriminator_forward(x, params, *, batch_tile=None,
                          compute_dtype=jnp.bfloat16):
    """params: list of (W, b) with W shape (in, out), b shape (out,).

    Returns (batch, 1) logits, matching Discriminator.forward.
    """
    batch, in_dim = x.shape
    n_layers = len(params)
    assert params[0][0].shape[0] == in_dim
    assert params[-1][0].shape[1] == 1

    if batch_tile is None:
        batch_tile = _pick_batch_tile(batch)
    assert batch % batch_tile == 0, "batch must be divisible by batch_tile"
    grid = (batch // batch_tile,)

    # ---- zero-pad all feature dims to multiples of 128 lanes (exact) ----
    in_p = _round_up(in_dim, LANE)
    x_p = _pad_to(x, (batch, in_p))

    flat_args = []
    in_specs = [pl.BlockSpec((batch_tile, in_p), lambda i: (i, 0))]
    flops = 0
    bytes_accessed = x_p.size * x_p.dtype.itemsize

    prev_p = in_p
    for (w, b) in params:
        out_dim = w.shape[1]
        out_p = _round_up(out_dim, LANE)
        w_p = _pad_to(w, (prev_p, out_p)).astype(compute_dtype)   # bf16 weights
        b_p = _pad_to(b, (out_p,)).astype(jnp.float32).reshape(1, out_p)

        flat_args.append(w_p)
        in_specs.append(pl.BlockSpec((prev_p, out_p), lambda i: (0, 0)))
        flat_args.append(b_p)
        in_specs.append(pl.BlockSpec((1, out_p), lambda i: (0, 0)))

        flops += 2 * batch * prev_p * out_p
        bytes_accessed += w_p.size * w_p.dtype.itemsize
        bytes_accessed += b_p.size * b_p.dtype.itemsize
        prev_p = out_p

    out_p = prev_p  # padded final width (128); real logit is column 0
    out_spec = pl.BlockSpec((batch_tile, out_p), lambda i: (i, 0))
    bytes_accessed += batch * out_p * jnp.dtype(x.dtype).itemsize

    kernel = functools.partial(_mlp_kernel, n_layers, compute_dtype)

    out_padded = pl.pallas_call(
        kernel,
        out_shape=jax.ShapeDtypeStruct((batch, out_p), x.dtype),
        grid_spec=pltpu.PrefetchScalarGridSpec(
            num_scalar_prefetch=0,
            grid=grid,
            in_specs=in_specs,
            out_specs=out_spec,
        ),
        compiler_params=pltpu.CompilerParams(
            dimension_semantics=("parallel",)),
        cost_estimate=pl.CostEstimate(
            flops=flops, transcendentals=0, bytes_accessed=bytes_accessed),
    )(x_p, *flat_args)

    return out_padded[:, :1]  # lane-dense store in-kernel; slice logit here


def init_discriminator_params(key, input_dim, hidden_layer_sizes):
    """Deterministic init mimicking nn.Linear default (uniform +/- 1/sqrt(fan_in)).

    Returns list of (W, b) with W already transposed to (in, out).
    """
    dims = [input_dim] + list(hidden_layer_sizes) + [1]
    params = []
    for i in range(len(dims) - 1):
        fan_in, fan_out = dims[i], dims[i + 1]
        key, kw, kb = jax.random.split(key, 3)
        bound = 1.0 / jnp.sqrt(fan_in)
        w = jax.random.uniform(kw, (fan_in, fan_out), jnp.float32, -bound, bound)
        b = jax.random.uniform(kb, (fan_out,), jnp.float32, -bound, bound)
        params.append((w, b))
    return params


def discriminator_reference(x, params, compute_dtype=jnp.bfloat16):
    """Pure-JAX reference mirroring the kernel's bf16-matmul / f32-accumulate math."""
    h = x.astype(jnp.float32)
    n = len(params)
    for i, (w, b) in enumerate(params):
        acc = jnp.dot(h.astype(compute_dtype), w.astype(compute_dtype),
                      preferred_element_type=jnp.float32) + b
        h = jnp.maximum(acc, 0.0) if i < n - 1 else acc
    return h


def discriminator_reference_f32(x, params):
    h = x
    n = len(params)
    for i, (w, b) in enumerate(params):
        h = h @ w + b
        if i < n - 1:
            h = jnp.maximum(h, 0.0)
    return h


if __name__ == "__main__":
    key = jax.random.PRNGKey(0)
    input_dim = 32
    hidden_layer_sizes = [64, 32]
    batch = 64

    k_x, k_p = jax.random.split(key)
    x = jax.random.normal(k_x, (batch, input_dim), dtype=jnp.float32)
    params = init_discriminator_params(k_p, input_dim, hidden_layer_sizes)

    # batch=64 <= 256  ->  whole batch in one grid step (grid=(1,))
    d = discriminator_forward(x, params)
    d = jax.block_until_ready(d)
    assert d.shape == (batch, 1)

    # Matches a reference that uses the same bf16-matmul / f32-accumulate math.
    d_ref = discriminator_reference(x, params)
    assert jnp.allclose(d, d_ref, atol=1e-4, rtol=1e-4), "mismatch vs bf16 reference"

    # Close to the full-f32 reference (bf16 MXU inputs, f32 accumulation).
    d_f32 = discriminator_reference_f32(x, params)
    assert jnp.allclose(d, d_f32, atol=3e-2, rtol=3e-2), "mismatch vs f32 reference"

    # TODO(synk): compute_grad_pen uses autograd.grad (training-time gradient
    # penalty), not part of the forward pass; not implemented as a kernel.
    print("KERNEL_OK")
</pallas_src>

<mosaic_0001>
module attributes {stable_mosaic.version = 11 : i64} {
  func.func @_mlp_kernel(%arg0: i32, %arg1: memref<64x128xf32, #tpu.memory_space<vmem>>, %arg2: memref<128x128xbf16, #tpu.memory_space<vmem>>, %arg3: memref<1x128xf32, #tpu.memory_space<vmem>>, %arg4: memref<128x128xbf16, #tpu.memory_space<vmem>>, %arg5: memref<1x128xf32, #tpu.memory_space<vmem>>, %arg6: memref<128x128xbf16, #tpu.memory_space<vmem>>, %arg7: memref<1x128xf32, #tpu.memory_space<vmem>>, %arg8: memref<64x128xf32, #tpu.memory_space<vmem>>) attributes {dimension_semantics = [#tpu.dimension_semantics<parallel>], iteration_bounds = array<i64: 1>, scalar_prefetch = 0 : i64, scratch_operands = 0 : i64, tpu.core_type = #tpu.core_type<tc>, window_params = [{transform_indices = @transform_0, window_bounds = array<i64: 64, 128>}, {pipeline_mode = #tpu.pipeline_mode<synchronous>, transform_indices = @transform_1, window_bounds = array<i64: 128, 128>}, {pipeline_mode = #tpu.pipeline_mode<synchronous>, transform_indices = @transform_2, window_bounds = array<i64: 1, 128>}, {pipeline_mode = #tpu.pipeline_mode<synchronous>, transform_indices = @transform_3, window_bounds = array<i64: 128, 128>}, {pipeline_mode = #tpu.pipeline_mode<synchronous>, transform_indices = @transform_4, window_bounds = array<i64: 1, 128>}, {pipeline_mode = #tpu.pipeline_mode<synchronous>, transform_indices = @transform_5, window_bounds = array<i64: 128, 128>}, {pipeline_mode = #tpu.pipeline_mode<synchronous>, transform_indices = @transform_6, window_bounds = array<i64: 1, 128>}, {transform_indices = @transform_7, window_bounds = array<i64: 64, 128>}]} {
    %c0 = arith.constant 0 : index
    %c0_0 = arith.constant 0 : index
    %0 = vector.load %arg1[%c0, %c0_0] : memref<64x128xf32, #tpu.memory_space<vmem>>, vector<64x128xf32>
    %c0_1 = arith.constant 0 : index
    %c0_2 = arith.constant 0 : index
    %1 = vector.load %arg2[%c0_1, %c0_2] : memref<128x128xbf16, #tpu.memory_space<vmem>>, vector<128x128xbf16>
    %c0_3 = arith.constant 0 : index
    %c0_4 = arith.constant 0 : index
    %2 = vector.load %arg3[%c0_3, %c0_4] : memref<1x128xf32, #tpu.memory_space<vmem>>, vector<1x128xf32>
    %3 = arith.truncf %0 : vector<64x128xf32> to vector<64x128xbf16>
    %cst = arith.constant dense<0.000000e+00> : vector<64x128xf32>
    %4 = tpu.matmul %3, %1, %cst {dimension_numbers = #tpu.dot_dimension_numbers<[1], [0], [0], [1], [0, 0, 1, 1], [], []>} : vector<64x128xbf16>, vector<128x128xbf16>, vector<64x128xf32> -> vector<64x128xf32>
    %5 = vector.broadcast %2 : vector<1x128xf32> to vector<64x128xf32>
    %6 = arith.addf %4, %5 : vector<64x128xf32>
    %cst_5 = arith.constant 0.000000e+00 : f32
    %7 = vector.broadcast %cst_5 : f32 to vector<64x128xf32>
    %8 = arith.maximumf %6, %7 : vector<64x128xf32>
    %c0_6 = arith.constant 0 : index
    %c0_7 = arith.constant 0 : index
    %9 = vector.load %arg4[%c0_6, %c0_7] : memref<128x128xbf16, #tpu.memory_space<vmem>>, vector<128x128xbf16>
    %c0_8 = arith.constant 0 : index
    %c0_9 = arith.constant 0 : index
    %10 = vector.load %arg5[%c0_8, %c0_9] : memref<1x128xf32, #tpu.memory_space<vmem>>, vector<1x128xf32>
    %11 = arith.truncf %8 : vector<64x128xf32> to vector<64x128xbf16>
    %cst_10 = arith.constant dense<0.000000e+00> : vector<64x128xf32>
    %12 = tpu.matmul %11, %9, %cst_10 {dimension_numbers = #tpu.dot_dimension_numbers<[1], [0], [0], [1], [0, 0, 1, 1], [], []>} : vector<64x128xbf16>, vector<128x128xbf16>, vector<64x128xf32> -> vector<64x128xf32>
    %13 = vector.broadcast %10 : vector<1x128xf32> to vector<64x128xf32>
    %14 = arith.addf %12, %13 : vector<64x128xf32>
    %cst_11 = arith.constant 0.000000e+00 : f32
    %15 = vector.broadcast %cst_11 : f32 to vector<64x128xf32>
    %16 = arith.maximumf %14, %15 : vector<64x128xf32>
    %c0_12 = arith.constant 0 : index
    %c0_13 = arith.constant 0 : index
    %17 = vector.load %arg6[%c0_12, %c0_13] : memref<128x128xbf16, #tpu.memory_space<vmem>>, vector<128x128xbf16>
    %c0_14 = arith.constant 0 : index
    %c0_15 = arith.constant 0 : index
    %18 = vector.load %arg7[%c0_14, %c0_15] : memref<1x128xf32, #tpu.memory_space<vmem>>, vector<1x128xf32>
    %19 = arith.truncf %16 : vector<64x128xf32> to vector<64x128xbf16>
    %cst_16 = arith.constant dense<0.000000e+00> : vector<64x128xf32>
    %20 = tpu.matmul %19, %17, %cst_16 {dimension_numbers = #tpu.dot_dimension_numbers<[1], [0], [0], [1], [0, 0, 1, 1], [], []>} : vector<64x128xbf16>, vector<128x128xbf16>, vector<64x128xf32> -> vector<64x128xf32>
    %21 = vector.broadcast %18 : vector<1x128xf32> to vector<64x128xf32>
    %22 = arith.addf %20, %21 : vector<64x128xf32>
    %c0_17 = arith.constant 0 : index
    %c0_18 = arith.constant 0 : index
    %23 = vector.load %arg8[%c0_17, %c0_18] : memref<64x128xf32, #tpu.memory_space<vmem>>, vector<64x128xf32>
    tpu.vector_store %arg8[%c0_17, %c0_18], %22 {strides = array<i32>} : memref<64x128xf32, #tpu.memory_space<vmem>>, vector<64x128xf32>,
    return
  }
  func.func @transform_0(%arg0: i32) -> (i32, i32) {
    %c0_i32 = arith.constant 0 : i32
    %c0_i32_0 = arith.constant 0 : i32
    return %arg0, %c0_i32 : i32, i32
  }
  func.func @transform_1(%arg0: i32) -> (i32, i32) {
    %c0_i32 = arith.constant 0 : i32
    %c0_i32_0 = arith.constant 0 : i32
    %c0_i32_1 = arith.constant 0 : i32
    return %c0_i32, %c0_i32_0 : i32, i32
  }
  func.func @transform_2(%arg0: i32) -> (i32, i32) {
    %c0_i32 = arith.constant 0 : i32
    %c0_i32_0 = arith.constant 0 : i32
    %c0_i32_1 = arith.constant 0 : i32
    return %c0_i32, %c0_i32_0 : i32, i32
  }
  func.func @transform_3(%arg0: i32) -> (i32, i32) {
    %c0_i32 = arith.constant 0 : i32
    %c0_i32_0 = arith.constant 0 : i32
    %c0_i32_1 = arith.constant 0 : i32
    return %c0_i32, %c0_i32_0 : i32, i32
  }
  func.func @transform_4(%arg0: i32) -> (i32, i32) {
    %c0_i32 = arith.constant 0 : i32
    %c0_i32_0 = arith.constant 0 : i32
    %c0_i32_1 = arith.constant 0 : i32
    return %c0_i32, %c0_i32_0 : i32, i32
  }
  func.func @transform_5(%arg0: i32) -> (i32, i32) {
    %c0_i32 = arith.constant 0 : i32
    %c0_i32_0 = arith.constant 0 : i32
    %c0_i32_1 = arith.constant 0 : i32
    return %c0_i32, %c0_i32_0 : i32, i32
  }
  func.func @transform_6(%arg0: i32) -> (i32, i32) {
    %c0_i32 = arith.constant 0 : i32
    %c0_i32_0 = arith.constant 0 : i32
    %c0_i32_1 = arith.constant 0 : i32
    return %c0_i32, %c0_i32_0 : i32, i32
  }
  func.func @transform_7(%arg0: i32) -> (i32, i32) {
    %c0_i32 = arith.constant 0 : i32
    %c0_i32_0 = arith.constant 0 : i32
    return %arg0, %c0_i32 : i32, i32
  }
}

</mosaic_0001>

<bundles_post_ra>
// kernel: tpu_custom_call.1
= control target key start
LH: loop header
LB: loop body
LE: loop exit
PB: predicated region body
PF: predicated region fallthrough
CT: control target
= control target key end

     0   :  { %12 = vsyncpa [#allocation3], 0  ;;  %s793_s0 = inlined_call_operand.hbm [shape: f32[64,128], index: 0, kind: input, shape index: {}]   ;;  %s794_s1 = inlined_call_operand.hbm [shape: bf16[128,128], index: 1, kind: input, shape index: {}]   ;;  %s795_s2 = inlined_call_operand.vmem [shape: f32[1,128], index: 2, kind: input, shape index: {}]   ;;  %s796_s3 = inlined_call_operand.hbm [shape: bf16[128,128], index: 3, kind: input, shape index: {}]   ;;  %s797_s4 = inlined_call_operand.vmem [shape: f32[1,128], index: 4, kind: input, shape index: {}]   ;;  %s798_s5 = inlined_call_operand.hbm [shape: bf16[128,128], index: 5, kind: input, shape index: {}]   ;;  %s799_s6 = inlined_call_operand.vmem [shape: f32[1,128], index: 6, kind: input, shape index: {}]   ;;  %s800_s7 = inlined_call_operand.hbm [shape: f32[64,128], index: 7, kind: output, shape index: {}]  }
   0x1   :  { %13 = vsyncpa [#allocation6], 0 }
   0x2   :  { %14 = vsyncpa [#allocation9], 0  ;;  %s33_s26 = sshll.u32 %s794_s1, 4  ;;  %s34_s26 = int_to_ptr.hbm [resolvable:$true] %s33_s26 }
   0x3   :  { %15 = vsyncpa [#allocation4], 0  ;;  %s714_s27 = smov [#allocation5]   ;;  %s20_s8 = sshll.u32 %s793_s0, 4  ;;  %s21_s8 = int_to_ptr.hbm [resolvable:$true] %s20_s8 }
   0x4   :  { %s35_s28 = sshll.u32 %s714_s27, 4  ;;  %s715_s9 = smov 64   ;;  %s36_s28 = int_to_ptr.vmem [resolvable:$true] %s35_s28 }
   0x5   :  { %s716_s10 = smov 4   ;;  %s717_s11 = smov [#allocation2]  }
   0x6   :  { %41 = dma.hbm_to_vmem [thread:$0]  %s34_s26, 1024, %s36_s28, [#allocation6], %s715_s9, %s715_s9, %s716_s10  }
   0x7   :  { %s22_s12 = sshll.u32 %s717_s11, 4  ;;  %s718_s13 = smov 128   ;;  %s23_s12 = int_to_ptr.vmem [resolvable:$true] %s22_s12 }
   0x8   :  { %s719_s14 = smov 8   ;;  %s48_s16 = sshll.u32 %s796_s3, 4  ;;  %s49_s16 = int_to_ptr.hbm [resolvable:$true] %s48_s16 }
   0x9   :  { %28 = dma.hbm_to_vmem [thread:$0]  %s21_s8, 1024, %s23_s12, [#allocation3], %s718_s13, %s718_s13, %s719_s14  }
   0xa   :  { %s720_s17 = smov [#allocation7]   ;;  %s63_s20 = sshll.u32 %s798_s5, 4  ;;  %s64_s20 = int_to_ptr.hbm [resolvable:$true] %s63_s20 }
   0xb   :  { %s50_s0 = sshll.u32 %s720_s17, 4  ;;  %s721_s21 = smov [#allocation8]   ;;  %s51_s0 = int_to_ptr.vmem [resolvable:$true] %s50_s0 }
   0xc   :  { %56 = dma.hbm_to_vmem [thread:$0]  %s49_s16, 1024, %s51_s0, [#allocation6], %s715_s9, %s715_s9, %s716_s10  }
   0xd   :  { %s65_s22 = sshll.u32 %s721_s21, 4  ;;  %s66_s22 = int_to_ptr.vmem [resolvable:$true] %s65_s22 }
   0xe   :  { %71 = dma.hbm_to_vmem [thread:$0]  %s64_s20, 1024, %s66_s22, [#allocation9], %s715_s9, %s715_s9, %s716_s10  }
   0xf   :  { %706 = dma.done.wait [#allocation3], 1024  }
  0x10   :  { %707 = vsyncadd [#allocation3], 4294966272 }
  0x11   :  { %708 = dma.done.wait [#allocation6], 2048  }
  0x12   :  { %709 = vsyncadd [#allocation6], 4294965248 }
  0x13   :  { %710 = dma.done.wait [#allocation9], 1024  }
  0x14   :  { %711 = vsyncadd [#allocation9], 4294966272  ;;  %v549_v0 = vld [vmem:[#allocation5 + $0x38] sm:$0xff]  ;;  %v548_v1 = vld [vmem:[#allocation5 + $0x30] sm:$0xff]  ;;  %s431_s28 = sshll.u32 %s800_s7, 4  ;;  %s432_s28 = int_to_ptr.hbm [resolvable:$true] %s431_s28 }
  0x15   :  { %170 = vmatpush.bf16.msra.mxu0 %v549_v0  ;;  %566 = vmatpush.bf16.msra.mxu3 %v549_v0  ;;  %v547_v2 = vld [vmem:[#allocation5 + $0x28] sm:$0xff]  ;;  %v546_v3 = vld [vmem:[#allocation5 + $0x20] sm:$0xff]  ;;  %v545_v4 = vld [vmem:[#allocation5 + $0x18] sm:$0xff] }
  0x16   :  { %v544_v5 = vld [vmem:[#allocation5 + $0x10] sm:$0xff]  ;;  %v543_v6 = vld [vmem:[#allocation5 + $0x8] sm:$0xff]  ;;  %v542_v7 = vld [vmem:[#allocation5] sm:$0xff] }
  0x17   :  { %v90_v8 = vld [vmem:[#allocation2] sm:$0xff]  ;;  %v91_v9 = vld [vmem:[#allocation2 + $0x8] sm:$0xff]  ;;  %v92_v10 = vld [vmem:[#allocation2 + $0x10] sm:$0xff] }
  0x18   :  { %v93_v11 = vld [vmem:[#allocation2 + $0x18] sm:$0xff]  ;;  %v115_v12 = vpack.c.bf16 %v91_v9, %v90_v8  ;;  %v556_v15 = vld [vmem:[#allocation7 + $0x30] sm:$0xff]  ;;  %v555_v16 = vld [vmem:[#allocation7 + $0x28] sm:$0xff] }
  0x19   :  { %171 = vmatpush.bf16.msra.mxu0 %v548_v1  ;;  %567 = vmatpush.bf16.msra.mxu3 %v548_v1  ;;  %v116_v13 = vpack.c.bf16 %v93_v11, %v92_v10  ;;  %v557_v14 = vld [vmem:[#allocation7 + $0x38] sm:$0xff]  ;;  %v94_v17 = vld [vmem:[#allocation2 + $0x20] sm:$0xff]  ;;  %v95_v18 = vld [vmem:[#allocation2 + $0x28] sm:$0xff] }
  0x1a   :  { %279 = vmatpush.bf16.msra.mxu1 %v557_v14  ;;  %v554_v19 = vld [vmem:[#allocation7 + $0x20] sm:$0xff]  ;;  %v117_v20 = vpack.c.bf16 %v95_v18, %v94_v17  ;;  %v96_v21 = vld [vmem:[#allocation2 + $0x30] sm:$0xff]  ;;  %v97_v22 = vld [vmem:[#allocation2 + $0x38] sm:$0xff] }
  0x1b   :  { %v118_v23 = vpack.c.bf16 %v97_v22, %v96_v21  ;;  %v553_v24 = vld [vmem:[#allocation7 + $0x18] sm:$0xff]  ;;  %v552_v25 = vld [vmem:[#allocation7 + $0x10] sm:$0xff]  ;;  %v551_v26 = vld [vmem:[#allocation7 + $0x8] sm:$0xff] }
  0x1c   :  { %v550_v27 = vld [vmem:[#allocation7] sm:$0xff]  ;;  %v565_v45 = vld [vmem:[#allocation8 + $0x38] sm:$0xff]  ;;  %v564_v46 = vld [vmem:[#allocation8 + $0x30] sm:$0xff] }
  0x1d   :  { %172 = vmatpush.bf16.msra.mxu0 %v547_v2  ;;  %568 = vmatpush.bf16.msra.mxu3 %v547_v2  ;;  %v583_v29 = vld [vmem:[%s795_s2] ss:$0 sm:$0xff]  ;;  %v563_v49 = vld [vmem:[#allocation8 + $0x28] sm:$0xff]  ;;  %v561_v61 = vld [vmem:[#allocation8 + $0x18] sm:$0xff] }
  0x1e   :  { %280 = vmatpush.bf16.msra.mxu1 %v556_v15  ;;  %388 = vmatpush.bf16.msra.mxu2 %v565_v45  ;;  %v562_v53 = vld [vmem:[#allocation8 + $0x20] sm:$0xff]  ;;  %v560_v62 = vld [vmem:[#allocation8 + $0x10] sm:$0xff]  ;;  %v559_v63 = vld [vmem:[#allocation8 + $0x8] sm:$0xff] }
  0x1f   :  { %v558_v0 = vld [vmem:[#allocation8] sm:$0xff] }
  0x20   :  { %v584_v2 = vld [vmem:[%s797_s4] ss:$0 sm:$0xff] }
  0x21   :  { %173 = vmatpush.bf16.msra.mxu0 %v546_v3  ;;  %569 = vmatpush.bf16.msra.mxu3 %v546_v3 }
  0x22   :  { %281 = vmatpush.bf16.msra.mxu1 %v555_v16  ;;  %389 = vmatpush.bf16.msra.mxu2 %v564_v46 }
  0x25   :  { %174 = vmatpush.bf16.msra.mxu0 %v545_v4  ;;  %570 = vmatpush.bf16.msra.mxu3 %v545_v4 }
  0x26   :  { %282 = vmatpush.bf16.msra.mxu1 %v554_v19  ;;  %390 = vmatpush.bf16.msra.mxu2 %v563_v49 }
  0x29   :  { %175 = vmatpush.bf16.msra.mxu0 %v544_v5  ;;  %571 = vmatpush.bf16.msra.mxu3 %v544_v5 }
  0x2a   :  { %283 = vmatpush.bf16.msra.mxu1 %v553_v24  ;;  %391 = vmatpush.bf16.msra.mxu2 %v562_v53 }
  0x2d   :  { %176 = vmatpush.bf16.msra.mxu0 %v543_v6  ;;  %572 = vmatpush.bf16.msra.mxu3 %v543_v6 }
  0x2e   :  { %284 = vmatpush.bf16.msra.mxu1 %v552_v25  ;;  %392 = vmatpush.bf16.msra.mxu2 %v561_v61 }
  0x31   :  { %177 = vmatpush.bf16.msra.mxu0 %v542_v7  ;;  %573 = vmatpush.bf16.msra.mxu3 %v542_v7 }
  0x32   :  { %285 = vmatpush.bf16.msra.mxu1 %v551_v26  ;;  %393 = vmatpush.bf16.msra.mxu2 %v560_v62 }
  0x34   :  { %178 = vmatmul.bf16.vlgmr.msra.gmra.mxu0 %v115_v12  ;;  %183 = vmatmul.bf16.vlgmr.msra.gmra.mxu3 %v116_v13 }
  0x36   :  { %286 = vmatpush.bf16.msra.mxu1 %v550_v27  ;;  %394 = vmatpush.bf16.msra.mxu2 %v559_v63 }
  0x3a   :  { %395 = vmatpush.bf16.msra.mxu2 %v558_v0 }
  0x44   :  { %188 = vmatmul.bf16.gmra.mxu3 %v117_v20 }
  0x54   :  { %193 = vmatmul.bf16.gmra.mxu3 %v118_v23 }
  0xb1   :  { %v179_v28 = vpop.f32.mrf.mxu0 }
  0xb2   :  { %v180_v31 = vadd.f32 %v583_v29, %v179_v28 }
  0xb4   :  { %v199_v34 = vmax.f32 %v180_v31, 0.0 }
  0xb7   :  { %v184_v30 = vpop.f32.mrf.mxu3 }
  0xb8   :  { %v185_v38 = vadd.f32 %v583_v29, %v184_v30  ;;  %v585_v30 = vld [vmem:[%s799_s6] ss:$0 sm:$0xff]  ;;  %s722_s6 = smov [#allocation10]  }
  0xb9   :  { %v181_v32 = vpop.f32.mrf.mxu0  ;;  %s429_s25 = sshll.u32 %s722_s6, 4  ;;  %s430_s25 = int_to_ptr.vmem [resolvable:$true] %s429_s25 }
  0xba   :  { %v182_v33 = vadd.f32 %v583_v29, %v181_v32  ;;  %v201_v41 = vmax.f32 %v185_v38, 0.0 }
  0xbc   :  { %v200_v35 = vmax.f32 %v182_v33, 0.0 }
  0xbe   :  { %v224_v36 = vpack.c.bf16 %v200_v35, %v199_v34 }
  0xbf   :  { %v186_v37 = vpop.f32.mrf.mxu3 }
  0xc0   :  { %287 = vmatmul.bf16.vlgmr.msra.gmra.mxu1 %v224_v36  ;;  %v187_v39 = vadd.f32 %v583_v29, %v186_v37 }
  0xc2   :  { %v202_v42 = vmax.f32 %v187_v39, 0.0 }
  0xc4   :  { %v225_v43 = vpack.c.bf16 %v202_v42, %v201_v41 }
  0xc7   :  { %v189_v40 = vpop.f32.mrf.mxu3 }
  0xc8   :  { %v190_v47 = vadd.f32 %v583_v29, %v189_v40 }
  0xca   :  { %v203_v51 = vmax.f32 %v190_v47, 0.0 }
  0xcf   :  { %v191_v44 = vpop.f32.mrf.mxu3 }
  0xd0   :  { %292 = vmatmul.bf16.gmra.mxu1 %v225_v43  ;;  %v192_v48 = vadd.f32 %v583_v29, %v191_v44 }
  0xd2   :  { %v204_v52 = vmax.f32 %v192_v48, 0.0 }
  0xd4   :  { %v226_v54 = vpack.c.bf16 %v204_v52, %v203_v51 }
  0xd7   :  { %v194_v50 = vpop.f32.mrf.mxu3 }
  0xd8   :  { %v195_v56 = vadd.f32 %v583_v29, %v194_v50 }
  0xda   :  { %v205_v58 = vmax.f32 %v195_v56, 0.0 }
  0xdf   :  { %v196_v55 = vpop.f32.mrf.mxu3 }
  0xe0   :  { %297 = vmatmul.bf16.gmra.mxu1 %v226_v54  ;;  %v197_v57 = vadd.f32 %v583_v29, %v196_v55 }
  0xe2   :  { %v206_v59 = vmax.f32 %v197_v57, 0.0 }
  0xe4   :  { %v227_v60 = vpack.c.bf16 %v206_v59, %v205_v58 }
  0xf0   :  { %302 = vmatmul.bf16.gmra.mxu1 %v227_v60 }
 0x13d   :  { %v288_v1 = vpop.f32.mrf.mxu1 }
 0x13e   :  { %v289_v3 = vadd.f32 %v584_v2, %v288_v1 }
 0x140   :  { %v308_v6 = vmax.f32 %v289_v3, 0.0 }
 0x145   :  { %v290_v4 = vpop.f32.mrf.mxu1 }
 0x146   :  { %v291_v5 = vadd.f32 %v584_v2, %v290_v4 }
 0x148   :  { %v309_v7 = vmax.f32 %v291_v5, 0.0 }
 0x14a   :  { %v333_v8 = vpack.c.bf16 %v309_v7, %v308_v6 }
 0x14c   :  { %396 = vmatmul.bf16.vlgmr.msra.gmra.mxu2 %v333_v8 }
 0x14d   :  { %v293_v9 = vpop.f32.mrf.mxu1 }
 0x14e   :  { %v294_v10 = vadd.f32 %v584_v2, %v293_v9 }
 0x150   :  { %v310_v13 = vmax.f32 %v294_v10, 0.0 }
 0x155   :  { %v295_v11 = vpop.f32.mrf.mxu1 }
 0x156   :  { %v296_v12 = vadd.f32 %v584_v2, %v295_v11 }
 0x158   :  { %v311_v14 = vmax.f32 %v296_v12, 0.0 }
 0x15a   :  { %v334_v15 = vpack.c.bf16 %v311_v14, %v310_v13 }
 0x15c   :  { %401 = vmatmul.bf16.gmra.mxu2 %v334_v15 }
 0x15d   :  { %v298_v16 = vpop.f32.mrf.mxu1 }
 0x15e   :  { %v299_v17 = vadd.f32 %v584_v2, %v298_v16 }
 0x160   :  { %v312_v20 = vmax.f32 %v299_v17, 0.0 }
 0x165   :  { %v300_v18 = vpop.f32.mrf.mxu1 }
 0x166   :  { %v301_v19 = vadd.f32 %v584_v2, %v300_v18 }
 0x168   :  { %v313_v21 = vmax.f32 %v301_v19, 0.0 }
 0x16a   :  { %v335_v22 = vpack.c.bf16 %v313_v21, %v312_v20 }
 0x16c   :  { %406 = vmatmul.bf16.gmra.mxu2 %v335_v22 }
 0x16d   :  { %v303_v23 = vpop.f32.mrf.mxu1 }
 0x16e   :  { %v304_v24 = vadd.f32 %v584_v2, %v303_v23 }
 0x170   :  { %v314_v27 = vmax.f32 %v304_v24, 0.0 }
 0x175   :  { %v305_v25 = vpop.f32.mrf.mxu1 }
 0x176   :  { %v306_v26 = vadd.f32 %v584_v2, %v305_v25 }
 0x178   :  { %v315_v28 = vmax.f32 %v306_v26, 0.0 }
 0x17a   :  { %v336_v29 = vpack.c.bf16 %v315_v28, %v314_v27 }
 0x17c   :  { %411 = vmatmul.bf16.gmra.mxu2 %v336_v29 }
 0x1cf   :  { %v397_v31 = vpop.f32.mrf.mxu2 }
 0x1d0   :  { %v398_v32 = vadd.f32 %v585_v30, %v397_v31 }
 0x1d2   :  { %417 = vst [vmem:[#allocation10] sm:$0xff] %v398_v32 }
 0x1d7   :  { %v399_v33 = vpop.f32.mrf.mxu2 }
 0x1d8   :  { %v400_v34 = vadd.f32 %v585_v30, %v399_v33 }
 0x1da   :  { %418 = vst [vmem:[#allocation10 + $0x8] sm:$0xff] %v400_v34 }
 0x1df   :  { %v402_v35 = vpop.f32.mrf.mxu2 }
 0x1e0   :  { %v403_v36 = vadd.f32 %v585_v30, %v402_v35 }
 0x1e2   :  { %419 = vst [vmem:[#allocation10 + $0x10] sm:$0xff] %v403_v36 }
 0x1e7   :  { %v404_v37 = vpop.f32.mrf.mxu2 }
 0x1e8   :  { %v405_v38 = vadd.f32 %v585_v30, %v404_v37 }
 0x1ea   :  { %420 = vst [vmem:[#allocation10 + $0x18] sm:$0xff] %v405_v38 }
 0x1ef   :  { %v407_v39 = vpop.f32.mrf.mxu2 }
 0x1f0   :  { %v408_v40 = vadd.f32 %v585_v30, %v407_v39 }
 0x1f2   :  { %421 = vst [vmem:[#allocation10 + $0x20] sm:$0xff] %v408_v40 }
 0x1f7   :  { %v409_v41 = vpop.f32.mrf.mxu2 }
 0x1f8   :  { %v410_v42 = vadd.f32 %v585_v30, %v409_v41 }
 0x1fa   :  { %422 = vst [vmem:[#allocation10 + $0x28] sm:$0xff] %v410_v42 }
 0x1ff   :  { %v412_v43 = vpop.f32.mrf.mxu2 }
 0x200   :  { %v413_v44 = vadd.f32 %v585_v30, %v412_v43 }
 0x202   :  { %423 = vst [vmem:[#allocation10 + $0x30] sm:$0xff] %v413_v44 }
 0x207   :  { %v414_v45 = vpop.f32.mrf.mxu2 }
 0x208   :  { %v415_v46 = vadd.f32 %v585_v30, %v414_v45 }
 0x20a   :  { %424 = vst [vmem:[#allocation10 + $0x38] sm:$0xff] %v415_v46 }
 0x20b   :  { %437 = dma.vmem_to_hbm [thread:$0]  %s430_s25, 1024, %s432_s28, [#allocation4], %s718_s13, %s718_s13, %s719_s14  }
 0x20c   :  { %712 = dma.done.wait [#allocation4], 1024  }
 0x20d   :  { %713 = vsyncadd [#allocation4], 4294966272 }
 0x20e   :  { %442 = vsyncpa [#allocation3], 1 }
 0x20f   :  { %443 = vsyncpa [#allocation6], 1 }
 0x210   :  { %444 = vsyncpa [#allocation9], 1 }
 0x211   :  { %445 = vsyncpa [#allocation4], 1 }

</bundles_post_ra>
